<compile_context>
chip_gen: v7x
topology: tpu7x:2x2x1
jax: 0.10.0
libtpu: 0.0.40
codegen_flags: <defaults>
</compile_context>

<pallas_src>
import functools

import jax
import jax.numpy as jnp
from jax.experimental import pallas as pl
from jax.experimental.pallas import tpu as pltpu


_NEG_BIG = -1.0e30  # bias value for padded (fake) action lanes


def _round_up(n, m):
    return ((n + m - 1) // m) * m


def _policy_kernel(x_ref, w1_ref, b1_ref, w2_ref, b2_ref, w3_ref, b3_ref,
                   logp_ref):
    """Fused 2-hidden-layer tanh MLP + log-softmax over the (padded) action lanes."""
    x = x_ref[...]
    h1 = jnp.tanh(
        jnp.dot(x, w1_ref[...], preferred_element_type=jnp.float32) + b1_ref[...])
    h2 = jnp.tanh(
        jnp.dot(h1, w2_ref[...], preferred_element_type=jnp.float32) + b2_ref[...])
    logits = (jnp.dot(h2, w3_ref[...], preferred_element_type=jnp.float32)
              + b3_ref[...])
    # Numerically-stable log-softmax over the lane (action) axis.
    # Padded lanes carry logits ~ -1e30 -> exp == 0 -> do not perturb the sum.
    m = jnp.max(logits, axis=-1, keepdims=True)
    z = logits - m
    denom = jnp.sum(jnp.exp(z), axis=-1, keepdims=True)
    logp_ref[...] = (z - jnp.log(denom)).astype(logp_ref.dtype)


@functools.partial(jax.jit, static_argnames=("tb",))
def policy_log_probs(x, params, tb=256):
    """Returns log π(a|s), shape [B, num_actions] (f32)."""
    w1, b1, w2, b2, w3, b3 = params
    B, state_dim = x.shape
    hidden = w1.shape[1]
    num_actions = w3.shape[1]

    # --- lane-dense action padding (unmasked full-lane output stores) --------
    lane = _round_up(max(num_actions, 128), 128)
    w3f = w3.astype(jnp.float32)
    b3f = b3.astype(jnp.float32).reshape(1, num_actions)
    if lane != num_actions:
        w3p = jnp.zeros((hidden, lane), jnp.float32).at[:, :num_actions].set(w3f)
        b3p = jnp.full((1, lane), _NEG_BIG, jnp.float32).at[:, :num_actions].set(b3f)
    else:
        w3p, b3p = w3f, b3f

    # --- batch tiling (sublane-aligned, well inside the 64 MiB v7x VMEM) -----
    TB = min(tb, _round_up(B, 8))
    TB = _round_up(TB, 8)
    Bp = _round_up(B, TB)
    if Bp != B:
        x = jnp.pad(x, ((0, Bp - B), (0, 0)))
    x = x.astype(jnp.float32)

    grid = (Bp // TB,)

    def full(a):
        # Grid-invariant block: same block index every step -> fetched once,
        # stays resident in VMEM across the whole batch loop.
        return pl.BlockSpec(a.shape, lambda i: tuple(0 for _ in a.shape))

    in_specs = [
        pl.BlockSpec((TB, state_dim), lambda i: (i, 0)),   # x : batch-tiled
        full(w1), full(b1), full(w2), full(b2),            # weights: resident
        full(w3p), full(b3p),
    ]
    out_specs = pl.BlockSpec((TB, lane), lambda i: (i, 0))

    flops = 2 * Bp * (state_dim * hidden + hidden * hidden + hidden * lane)
    transcendentals = Bp * (2 * hidden + lane + 1)          # tanh + exp + log
    bytes_accessed = 4 * (Bp * state_dim + Bp * lane
                          + state_dim * hidden + hidden
                          + hidden * hidden + hidden
                          + hidden * lane + lane)

    logp = pl.pallas_call(
        _policy_kernel,
        out_shape=jax.ShapeDtypeStruct((Bp, lane), jnp.float32),
        grid=grid,
        in_specs=in_specs,
        out_specs=out_specs,
        compiler_params=pltpu.CompilerParams(
            dimension_semantics=("parallel",)),
        cost_estimate=pl.CostEstimate(
            flops=flops,
            transcendentals=transcendentals,
            bytes_accessed=bytes_accessed),
    )(x, w1.astype(jnp.float32), b1.astype(jnp.float32).reshape(1, -1),
      w2.astype(jnp.float32), b2.astype(jnp.float32).reshape(1, -1), w3p, b3p)

    return logp[:B, :num_actions]


def policy_forward(x, params):
    """Returns Categorical action probabilities, shape [B, num_actions]."""
    return jnp.exp(policy_log_probs(x, params))


def select_action(x, params, mean_action=True, key=None):
    logp = policy_log_probs(x, params)
    if mean_action:
        # mean_sample() of a Categorical == argmax of probabilities
        return jnp.argmax(logp, axis=-1)
    if key is None:
        key = jax.random.PRNGKey(0)
    return jax.random.categorical(key, logp, axis=-1)


def get_log_prob(x, params, action):
    logp = policy_log_probs(x, params)
    return jnp.take_along_axis(logp, action[:, None], axis=-1)[:, 0]


def get_kl(x, params):
    # Standard TRPO-style KL( stop_grad(pi) || pi ) per state (zero-valued,
    # non-zero Hessian-vector products).
    logp = policy_log_probs(x, params)
    logp0 = jax.lax.stop_gradient(logp)
    p0 = jnp.exp(logp0)
    return jnp.sum(p0 * (logp0 - logp), axis=-1, keepdims=True)


def init_params(key, state_dim, hidden, num_actions):
    ks = jax.random.split(key, 3)
    w1 = 0.1 * jax.random.normal(ks[0], (state_dim, hidden), jnp.float32)
    b1 = jnp.zeros((1, hidden), jnp.float32)
    w2 = 0.1 * jax.random.normal(ks[1], (hidden, hidden), jnp.float32)
    b2 = jnp.zeros((1, hidden), jnp.float32)
    w3 = 0.1 * jax.random.normal(ks[2], (hidden, num_actions), jnp.float32)
    b3 = jnp.zeros((1, num_actions), jnp.float32)
    return (w1, b1, w2, b2, w3, b3)


if __name__ == "__main__":
    key = jax.random.PRNGKey(0)
    kx, kp = jax.random.split(key)

    B, state_dim, hidden, num_actions = 2, 16, 32, 8
    x = jax.random.normal(kx, (B, state_dim), jnp.float32)
    params = init_params(kp, state_dim, hidden, num_actions)

    logp = jax.block_until_ready(policy_log_probs(x, params))
    probs = jax.block_until_ready(policy_forward(x, params))

    # pure-JAX reference for sanity
    w1, b1, w2, b2, w3, b3 = params
    h1 = jnp.tanh(x @ w1 + b1)
    h2 = jnp.tanh(h1 @ w2 + b2)
    logits = h2 @ w3 + b3
    ref_logp = jax.nn.log_softmax(logits, axis=-1)
    ref_probs = jax.nn.softmax(logits, axis=-1)
    assert logp.shape == (B, num_actions)
    assert jnp.allclose(logp, ref_logp, atol=1e-5, rtol=1e-5)
    assert jnp.allclose(probs, ref_probs, atol=1e-5, rtol=1e-5)
    assert jnp.allclose(jnp.sum(probs, axis=-1), 1.0, atol=1e-5)

    # batch that is not a multiple of the tile / sublane size
    B2 = 13
    x2 = jax.random.normal(jax.random.PRNGKey(3), (B2, state_dim), jnp.float32)
    p2 = jax.block_until_ready(policy_forward(x2, params))
    r2 = jax.nn.softmax(jnp.tanh(jnp.tanh(x2 @ w1 + b1) @ w2 + b2) @ w3 + b3, -1)
    assert p2.shape == (B2, num_actions)
    assert jnp.allclose(p2, r2, atol=1e-5, rtol=1e-5)

    a = jax.block_until_ready(select_action(x, params, mean_action=True))
    a_s = jax.block_until_ready(
        select_action(x, params, mean_action=False, key=jax.random.PRNGKey(1)))
    lp = jax.block_until_ready(get_log_prob(x, params, a))
    kl = jax.block_until_ready(get_kl(x, params))
    assert a.shape == (B,) and a_s.shape == (B,) and lp.shape == (B,)
    assert kl.shape == (B, 1)
    assert jnp.allclose(lp, jnp.take_along_axis(ref_logp, a[:, None], -1)[:, 0],
                        atol=1e-5, rtol=1e-5)

    print("KERNEL_OK")
</pallas_src>

<mosaic_0001>
module attributes {stable_mosaic.version = 11 : i64} {
  func.func @_policy_kernel(%arg0: i32, %arg1: memref<8x16xf32, #tpu.memory_space<vmem>>, %arg2: memref<16x32xf32, #tpu.memory_space<vmem>>, %arg3: memref<1x32xf32, #tpu.memory_space<vmem>>, %arg4: memref<32x32xf32, #tpu.memory_space<vmem>>, %arg5: memref<1x32xf32, #tpu.memory_space<vmem>>, %arg6: memref<32x128xf32, #tpu.memory_space<vmem>>, %arg7: memref<1x128xf32, #tpu.memory_space<vmem>>, %arg8: memref<8x128xf32, #tpu.memory_space<vmem>>) attributes {dimension_semantics = [#tpu.dimension_semantics<parallel>], iteration_bounds = array<i64: 1>, scalar_prefetch = 0 : i64, scratch_operands = 0 : i64, tpu.core_type = #tpu.core_type<tc>, window_params = [{transform_indices = @transform_0, window_bounds = array<i64: 8, 16>}, {pipeline_mode = #tpu.pipeline_mode<synchronous>, transform_indices = @transform_1, window_bounds = array<i64: 16, 32>}, {pipeline_mode = #tpu.pipeline_mode<synchronous>, transform_indices = @transform_2, window_bounds = array<i64: 1, 32>}, {pipeline_mode = #tpu.pipeline_mode<synchronous>, transform_indices = @transform_3, window_bounds = array<i64: 32, 32>}, {pipeline_mode = #tpu.pipeline_mode<synchronous>, transform_indices = @transform_4, window_bounds = array<i64: 1, 32>}, {pipeline_mode = #tpu.pipeline_mode<synchronous>, transform_indices = @transform_5, window_bounds = array<i64: 32, 128>}, {pipeline_mode = #tpu.pipeline_mode<synchronous>, transform_indices = @transform_6, window_bounds = array<i64: 1, 128>}, {transform_indices = @transform_7, window_bounds = array<i64: 8, 128>}]} {
    %c0 = arith.constant 0 : index
    %c0_0 = arith.constant 0 : index
    %0 = vector.load %arg1[%c0, %c0_0] : memref<8x16xf32, #tpu.memory_space<vmem>>, vector<8x16xf32>
    %c0_1 = arith.constant 0 : index
    %c0_2 = arith.constant 0 : index
    %1 = vector.load %arg2[%c0_1, %c0_2] : memref<16x32xf32, #tpu.memory_space<vmem>>, vector<16x32xf32>
    %cst = arith.constant dense<0.000000e+00> : vector<8x32xf32>
    %2 = tpu.matmul %0, %1, %cst {dimension_numbers = #tpu.dot_dimension_numbers<[1], [0], [0], [1], [0, 0, 1, 1], [], []>} : vector<8x16xf32>, vector<16x32xf32>, vector<8x32xf32> -> vector<8x32xf32>
    %c0_3 = arith.constant 0 : index
    %c0_4 = arith.constant 0 : index
    %3 = vector.load %arg3[%c0_3, %c0_4] : memref<1x32xf32, #tpu.memory_space<vmem>>, vector<1x32xf32>
    %4 = vector.broadcast %3 : vector<1x32xf32> to vector<8x32xf32>
    %5 = arith.addf %2, %4 : vector<8x32xf32>
    %6 = math.tanh %5 : vector<8x32xf32>
    %c0_5 = arith.constant 0 : index
    %c0_6 = arith.constant 0 : index
    %7 = vector.load %arg4[%c0_5, %c0_6] : memref<32x32xf32, #tpu.memory_space<vmem>>, vector<32x32xf32>
    %cst_7 = arith.constant dense<0.000000e+00> : vector<8x32xf32>
    %8 = tpu.matmul %6, %7, %cst_7 {dimension_numbers = #tpu.dot_dimension_numbers<[1], [0], [0], [1], [0, 0, 1, 1], [], []>} : vector<8x32xf32>, vector<32x32xf32>, vector<8x32xf32> -> vector<8x32xf32>
    %c0_8 = arith.constant 0 : index
    %c0_9 = arith.constant 0 : index
    %9 = vector.load %arg5[%c0_8, %c0_9] : memref<1x32xf32, #tpu.memory_space<vmem>>, vector<1x32xf32>
    %10 = vector.broadcast %9 : vector<1x32xf32> to vector<8x32xf32>
    %11 = arith.addf %8, %10 : vector<8x32xf32>
    %12 = math.tanh %11 : vector<8x32xf32>
    %c0_10 = arith.constant 0 : index
    %c0_11 = arith.constant 0 : index
    %13 = vector.load %arg6[%c0_10, %c0_11] : memref<32x128xf32, #tpu.memory_space<vmem>>, vector<32x128xf32>
    %cst_12 = arith.constant dense<0.000000e+00> : vector<8x128xf32>
    %14 = tpu.matmul %12, %13, %cst_12 {dimension_numbers = #tpu.dot_dimension_numbers<[1], [0], [0], [1], [0, 0, 1, 1], [], []>} : vector<8x32xf32>, vector<32x128xf32>, vector<8x128xf32> -> vector<8x128xf32>
    %c0_13 = arith.constant 0 : index
    %c0_14 = arith.constant 0 : index
    %15 = vector.load %arg7[%c0_13, %c0_14] : memref<1x128xf32, #tpu.memory_space<vmem>>, vector<1x128xf32>
    %16 = vector.broadcast %15 : vector<1x128xf32> to vector<8x128xf32>
    %17 = arith.addf %14, %16 : vector<8x128xf32>
    %cst_15 = arith.constant dense<0xFF800000> : vector<8xf32>
    %18 = vector.multi_reduction <maximumf>, %17, %cst_15 [1] : vector<8x128xf32> to vector<8xf32>
    %19 = vector.shape_cast %18 : vector<8xf32> to vector<8x1xf32>
    %20 = vector.broadcast %19 : vector<8x1xf32> to vector<8x128xf32>
    %21 = arith.subf %17, %20 : vector<8x128xf32>
    %22 = math.exp %21 : vector<8x128xf32>
    %cst_16 = arith.constant dense<0.000000e+00> : vector<8xf32>
    %23 = vector.multi_reduction <add>, %22, %cst_16 [1] : vector<8x128xf32> to vector<8xf32>
    %24 = vector.shape_cast %23 : vector<8xf32> to vector<8x1xf32>
    %25 = math.log %24 : vector<8x1xf32>
    %26 = vector.broadcast %25 : vector<8x1xf32> to vector<8x128xf32>
    %27 = arith.subf %21, %26 : vector<8x128xf32>
    %c0_17 = arith.constant 0 : index
    %c0_18 = arith.constant 0 : index
    %28 = vector.load %arg8[%c0_17, %c0_18] : memref<8x128xf32, #tpu.memory_space<vmem>>, vector<8x128xf32>
    tpu.vector_store %arg8[%c0_17, %c0_18], %27 {strides = array<i32>} : memref<8x128xf32, #tpu.memory_space<vmem>>, vector<8x128xf32>,
    return
  }
  func.func @transform_0(%arg0: i32) -> (i32, i32) {
    %c0_i32 = arith.constant 0 : i32
    %c0_i32_0 = arith.constant 0 : i32
    return %arg0, %c0_i32 : i32, i32
  }
  func.func @transform_1(%arg0: i32) -> (i32, i32) {
    %c0_i32 = arith.constant 0 : i32
    %c0_i32_0 = arith.constant 0 : i32
    %c0_i32_1 = arith.constant 0 : i32
    return %c0_i32, %c0_i32_0 : i32, i32
  }
  func.func @transform_2(%arg0: i32) -> (i32, i32) {
    %c0_i32 = arith.constant 0 : i32
    %c0_i32_0 = arith.constant 0 : i32
    %c0_i32_1 = arith.constant 0 : i32
    return %c0_i32, %c0_i32_0 : i32, i32
  }
  func.func @transform_3(%arg0: i32) -> (i32, i32) {
    %c0_i32 = arith.constant 0 : i32
    %c0_i32_0 = arith.constant 0 : i32
    %c0_i32_1 = arith.constant 0 : i32
    return %c0_i32, %c0_i32_0 : i32, i32
  }
  func.func @transform_4(%arg0: i32) -> (i32, i32) {
    %c0_i32 = arith.constant 0 : i32
    %c0_i32_0 = arith.constant 0 : i32
    %c0_i32_1 = arith.constant 0 : i32
    return %c0_i32, %c0_i32_0 : i32, i32
  }
  func.func @transform_5(%arg0: i32) -> (i32, i32) {
    %c0_i32 = arith.constant 0 : i32
    %c0_i32_0 = arith.constant 0 : i32
    %c0_i32_1 = arith.constant 0 : i32
    return %c0_i32, %c0_i32_0 : i32, i32
  }
  func.func @transform_6(%arg0: i32) -> (i32, i32) {
    %c0_i32 = arith.constant 0 : i32
    %c0_i32_0 = arith.constant 0 : i32
    %c0_i32_1 = arith.constant 0 : i32
    return %c0_i32, %c0_i32_0 : i32, i32
  }
  func.func @transform_7(%arg0: i32) -> (i32, i32) {
    %c0_i32 = arith.constant 0 : i32
    %c0_i32_0 = arith.constant 0 : i32
    return %arg0, %c0_i32 : i32, i32
  }
}

</mosaic_0001>

<bundles_post_ra>
// kernel: policy_log_probs.1
= control target key start
LH: loop header
LB: loop body
LE: loop exit
PB: predicated region body
PF: predicated region fallthrough
CT: control target
= control target key end

     0   :  { %v370_v0 = vmov 0.0|0.0   ;;  %vm371_vm0 = vmmov 0   ;;  %v372_v3 = vmov 0.0   ;;  %vm36_vm1 = vcmask 130048   ;;  %s460_s1 = inlined_call_operand.vmem [shape: f32[16,32], index: 1, kind: input, shape index: {}]   ;;  %s461_s0 = inlined_call_operand.vmem [shape: f32[8,16], index: 0, kind: input, shape index: {}]   ;;  %s462_s3 = inlined_call_operand.vmem [shape: f32[32,32], index: 3, kind: input, shape index: {}]   ;;  %s463_s2 = inlined_call_operand.vmem [shape: f32[1,32], index: 2, kind: input, shape index: {}]   ;;  %s464_s5 = inlined_call_operand.vmem [shape: f32[32,128], index: 5, kind: input, shape index: {}]   ;;  %s465_s4 = inlined_call_operand.vmem [shape: f32[1,32], index: 4, kind: input, shape index: {}]   ;;  %s466_s6 = inlined_call_operand.vmem [shape: f32[1,128], index: 6, kind: input, shape index: {}]   ;;  %s467_s7 = inlined_call_operand.vmem [shape: f32[8,128], index: 7, kind: output, shape index: {}]  }
   0x1   :  { %344 = vmatprep.subr.bf16.mxu0 %v370_v0  ;;  %v27_v1 = vld [vmem:[%s460_s1] sm:$0xff]  ;;  %v28_v2 = vld [vmem:[%s460_s1 + $0x8] sm:$0xff]  ;;  %319 = vmatprep.mubr.msk.f32.mxu0 %vm371_vm0, %v372_v3  ;;  %v113_v8 = vld [vmem:[%s462_s3 + $0x10] sm:$0xff]  ;;  %vm122_vm2 = vcmask 261120  }
   0x2   :  { %v345_v4 = vpack.c.bf16 %v28_v2, %v27_v1  ;;  %347 = vmatprep.subr.bf16.mxu1 %v370_v0  ;;  %330 = vmatprep.mubr.msk.f32.mxu1 %vm371_vm0, %v372_v3  ;;  %v26_v5 = vld [vmem:[%s461_s0] sm:$0xff]  ;;  %v112_v7 = vld [vmem:[%s462_s3 + $0x8] sm:$0xff]  ;;  %v114_v10 = vld [vmem:[%s462_s3 + $0x18] sm:$0xff] }
   0x3   :  { %v111_v6 = vld [vmem:[%s462_s3] sm:$0xff]  ;;  %v351_v11 = vpack.c.bf16 %v114_v10, %v113_v8  ;;  %v198_v18 = vld [vmem:[%s464_s5 + $0x8] sm:$0xff]  ;;  %v199_v19 = vld [vmem:[%s464_s5 + $0x10] sm:$0xff] }
   0x4   :  { %346 = vmatpush3.bf16.msra.mxu0 %v345_v4  ;;  %v348_v9 = vpack.c.bf16 %v112_v7, %v111_v6  ;;  %v296_v12 = vld [vmem:[%s463_s2] ss:$0 sm:$0xff]  ;;  %v200_v21 = vld [vmem:[%s464_s5 + $0x18] sm:$0xff] }
   0x5   :  { %353 = vmatprep.subr.bf16.mxu0 %v370_v0  ;;  %v197_v17 = vld [vmem:[%s464_s5] sm:$0xff]  ;;  %v357_v22 = vpack.c.bf16 %v200_v21, %v199_v19 }
   0x6   :  { %349 = vmatpush3.bf16.msra.mxu1 %v348_v9  ;;  %v354_v20 = vpack.c.bf16 %v198_v18, %v197_v17  ;;  %v298_v23 = vld [vmem:[%s465_s4] ss:$0 sm:$0xff] }
   0x7   :  { %320 = vmatmul.mubr.msk.f32.vlgmr.msra.gmra.mrb[0].mxu0 %vm36_vm1, %v26_v5  ;;  %350 = vmatprep.subr.bf16.mxu1 %v370_v0  ;;  %v300_v28 = vld [vmem:[%s466_s6] ss:$0 sm:$0xff] }
   0x8   :  { %341 = vmatprep.mubr.msk.f32.mxu0 %vm371_vm0, %v372_v3  ;;  %355 = vmatpush3.bf16.msra.mxu0 %v354_v20 }
   0x9   :  { %356 = vmatprep.subr.bf16.mxu0 %v370_v0 }
   0xa   :  { %352 = vmatpush3.bf16.msra.mxu1 %v351_v11 }
   0xc   :  { %358 = vmatpush3.bf16.msra.mxu0 %v357_v22 }
  0xda   :  { %v106_v13 = vpop.f32.mrb[0].mxu0 }
  0xdb   :  { %v107_v14 = vadd.f32 %v296_v12, %v106_v13  ;;  %v321_v15 = vpop.f32.mrb[1].mxu0 }
  0xdd   :  { %362 = vtanh.f32 %v107_v14 }
  0xe7   :  { %v363_v16 = vpop.eup %362 }
  0xe8   :  { %331 = vmatmul.mubr.msk.f32.vlgmr.msra.gmra.mrb[0].mxu1 %vm122_vm2, %v363_v16 }
 0x1bb   :  { %v192_v24 = vpop.f32.mrb[0].mxu1 }
 0x1bc   :  { %v193_v25 = vadd.f32 %v298_v23, %v192_v24  ;;  %v332_v26 = vpop.f32.mrb[1].mxu1 }
 0x1be   :  { %364 = vtanh.f32 %v193_v25 }
 0x1c8   :  { %v365_v27 = vpop.eup %364 }
 0x1c9   :  { %342 = vmatmul.mubr.msk.f32.vlgmr.msra.gmra.mrb[2].mxu0 %vm122_vm2, %v365_v27 }
 0x29c   :  { %v277_v29 = vpop.f32.mrb[2].mxu0 }
 0x29d   :  { %v278_v30 = vadd.f32 %v300_v28, %v277_v29  ;;  %v343_v31 = vpop.f32.mrb[3].mxu0 }
 0x29f   :  { %281 = vmax.xlane.f32.xlu0 %v278_v30 }
 0x32c   :  { %v282_v32 = vpop.xlane.xlu0 %281 }
 0x32d   :  { %v283_v33 = vsub.f32 %v278_v30, %v282_v32 }
 0x32f   :  { %v284_v34 = vmul.f32 1.442695, %v283_v33 }
 0x331   :  { %366 = vpow2.f32 %v284_v34 }
 0x33b   :  { %v367_v35 = vpop.eup %366 }
 0x33c   :  { %286 = vadd.xlane.f32.xlu0 %v367_v35 }
 0x3c9   :  { %v287_v36 = vpop.xlane.xlu0 %286 }
 0x3ca   :  { %368 = vlog2.f32 %v287_v36 }
 0x3d4   :  { %v369_v37 = vpop.eup %368 }
 0x3d5   :  { %v289_v38 = vmul.f32 0.6931472, %v369_v37 }
 0x3d7   :  { %v290_v39 = vsub.f32 %v283_v33, %v289_v38 }
 0x3d9   :  { %291 = vst [vmem:[%s467_s7] sm:$0xff] %v290_v39 }

</bundles_post_ra>
